<compile_context>
chip_gen: v5e
topology: v5e:2x2
jax: 0.10.0
libtpu: 0.0.40
codegen_flags: <defaults>
</compile_context>

<pallas_src>
import jax
import jax.numpy as jnp
from jax.experimental import pallas as pl
from jax.experimental.pallas import tpu as pltpu

LP_DTYPE = jnp.float8_e4m3fn
FP8_MAX = float(jnp.finfo(LP_DTYPE).max)   # 448.0
FP8_MIN = float(jnp.finfo(LP_DTYPE).min)   # -448.0

_LANE = 512                          # lane-dense flattened view width (mult of 128)
_BLOCK_ROWS = 4096                   # 4096 x 512 x 4B = 8 MiB f32 input per block
_PC_BLOCK_BYTES = 4 * 1024 * 1024    # per-channel target input bytes per block
_VMEM_LIMIT = 32 * 1024 * 1024       # scoped VMEM ceiling (safe on v5e/v6e/v7x)


def _round_up(v, m):
    return ((v + m - 1) // m) * m


# ----------------------------------------------------------------------------
# Kernels
# ----------------------------------------------------------------------------

def _quant_per_tensor_kernel(scale_ref, x_ref, o_ref):
    # scale_ref: SMEM (1,) fp32 scalar scale_inv
    s = scale_ref[0]
    y = x_ref[...].astype(jnp.float32) * s
    # HPU cast_to_fp8 saturates to the representable fp8 range (e4m3fn has no
    # Inf): +/-Inf clip to +/-448 here; NaN passes through clip -> fp8 NaN.
    y = jnp.clip(y, FP8_MIN, FP8_MAX)
    o_ref[...] = y.astype(o_ref.dtype)


def _quant_per_channel_kernel(x_ref, s_ref, o_ref):
    # x_ref: (tile_c, tile_k), s_ref: (tile_c, 1) -> row-wise broadcast
    # (the scale_inv.unsqueeze(1) branch of the module).
    y = x_ref[...].astype(jnp.float32) * s_ref[...].astype(jnp.float32)
    y = jnp.clip(y, FP8_MIN, FP8_MAX)
    o_ref[...] = y.astype(o_ref.dtype)


# ----------------------------------------------------------------------------
# Per-tensor path
# ----------------------------------------------------------------------------

def _choose_block_rows(rows):
    block_rows = min(_BLOCK_ROWS, rows)
    if rows > 64:
        # Guarantee >= 2 grid steps (multiple-of-32 blocks for fp8 packing) so
        # the "parallel" grid axis gives both v7x TensorCores work.
        block_rows = min(block_rows, _round_up(pl.cdiv(rows, 2), 32))
    return block_rows


def _quant_per_tensor(x, scale_inv, lp_dtype):
    orig_shape = x.shape
    n = x.size
    flat = x.reshape(-1)
    scale = scale_inv.reshape(1).astype(jnp.float32)
    itemsize = jnp.dtype(x.dtype).itemsize

    n_main = (n // _LANE) * _LANE
    tail_out = None
    if n_main < n:
        # <512-element tail: quantize with plain jnp (negligible work) instead
        # of padding/slicing the whole array, which doubles HBM traffic.
        tail = flat[n_main:]
        tail_out = jnp.clip(tail.astype(jnp.float32) * scale[0],
                            FP8_MIN, FP8_MAX).astype(lp_dtype)

    if n_main == 0:
        out_flat = tail_out
    else:
        rows = n_main // _LANE
        x2 = flat[:n_main].reshape(rows, _LANE)
        block_rows = _choose_block_rows(rows)
        grid = (pl.cdiv(rows, block_rows),)

        out = pl.pallas_call(
            _quant_per_tensor_kernel,
            out_shape=jax.ShapeDtypeStruct((rows, _LANE), lp_dtype),
            grid=grid,
            in_specs=[
                pl.BlockSpec(memory_space=pltpu.MemorySpace.SMEM),
                pl.BlockSpec((block_rows, _LANE), lambda i: (i, 0)),
            ],
            out_specs=pl.BlockSpec((block_rows, _LANE), lambda i: (i, 0)),
            compiler_params=pltpu.CompilerParams(
                dimension_semantics=("parallel",),
                vmem_limit_bytes=_VMEM_LIMIT,
            ),
            cost_estimate=pl.CostEstimate(
                flops=2 * n_main,
                transcendentals=0,
                # read x (itemsize B/elem), write fp8 (1 B/elem), scale scalar
                bytes_accessed=n_main * itemsize + n_main + 4,
            ),
        )(scale, x2)

        out_flat = out.reshape(-1)
        if tail_out is not None:
            out_flat = jnp.concatenate([out_flat, tail_out])

    return out_flat.reshape(orig_shape)


# ----------------------------------------------------------------------------
# Per-channel path
# ----------------------------------------------------------------------------

def _pc_tiles(C, K, itemsize):
    """Pick (tile_c, tile_k). Prefer full-width (contiguous DMA) tiles."""
    row_bytes = max(K * itemsize, 1)
    rows_fit = _PC_BLOCK_BYTES // row_bytes          # full-width rows in budget
    if rows_fit >= min(C, 32):
        if rows_fit >= C:
            tile_c = C
        else:
            tile_c = (rows_fit // 32) * 32
        if C > 64:
            # keep >= 2 grid steps so megacore can shard the row axis
            tile_c = min(tile_c, _round_up(pl.cdiv(C, 2), 32))
        return max(min(tile_c, C), 1), K
    # K is enormous: fall back to tiling K in large 128-aligned chunks.
    tile_k = max((_PC_BLOCK_BYTES // (32 * itemsize)) // 128 * 128, 128)
    return min(32, C), min(tile_k, K)


def _quant_per_channel(x, scale_inv, lp_dtype):
    assert x.ndim == 2, "per-channel path expects a 2D (C, K) tensor"
    C, K = x.shape
    if scale_inv.size != C:
        raise ValueError(
            f"per-channel scale_inv must have one entry per row: got "
            f"{scale_inv.size} scales for {C} rows")
    s = scale_inv.reshape(C, 1).astype(jnp.float32)
    itemsize = jnp.dtype(x.dtype).itemsize

    tile_c, tile_k = _pc_tiles(C, K, itemsize)
    grid = (pl.cdiv(C, tile_c), pl.cdiv(K, tile_k))

    return pl.pallas_call(
        _quant_per_channel_kernel,
        out_shape=jax.ShapeDtypeStruct((C, K), lp_dtype),
        grid=grid,
        in_specs=[
            pl.BlockSpec((tile_c, tile_k), lambda i, j: (i, j)),
            # Scale block ignores the inner K axis -> stays resident across
            # the K sweep (no re-fetch per j step).
            pl.BlockSpec((tile_c, 1), lambda i, j: (i, 0)),
        ],
        out_specs=pl.BlockSpec((tile_c, tile_k), lambda i, j: (i, j)),
        compiler_params=pltpu.CompilerParams(
            dimension_semantics=("parallel", "arbitrary"),
            vmem_limit_bytes=_VMEM_LIMIT,
        ),
        cost_estimate=pl.CostEstimate(
            flops=2 * C * K,
            transcendentals=0,
            bytes_accessed=C * K * itemsize + C * K + 4 * C,
        ),
    )(x, s)


# ----------------------------------------------------------------------------
# Public entry point (QuantInput.forward, use_qdq=False)
# ----------------------------------------------------------------------------

def quant_input_forward(x, scale_inv, lp_dtype=LP_DTYPE):
    """JAX/Pallas equivalent of QuantInput.forward (use_qdq=False)."""
    scale_inv = jnp.asarray(scale_inv)
    if scale_inv.size == 1:
        return _quant_per_tensor(x, scale_inv, lp_dtype)
    return _quant_per_channel(x, scale_inv, lp_dtype)


# TODO(synk): forward_qdq (use_qdq=True, torch quantize_per_tensor/per_channel
# with zero_point) is not implemented; the default cast-to-fp8 path above is
# what QuantInput.forward executes.


if __name__ == "__main__":
    key = jax.random.PRNGKey(0)
    k1, k2, k3 = jax.random.split(key, 3)

    # --- per-tensor case: activation-style NCHW input ---
    x = jax.random.normal(k1, (2, 4, 16, 16), dtype=jnp.float32) * 3.0
    scale_inv = jnp.float32(FP8_MAX) / jnp.max(jnp.abs(x))  # calibration-style scale

    out = jax.block_until_ready(quant_input_forward(x, scale_inv))
    assert out.dtype == LP_DTYPE and out.shape == x.shape
    ref = jnp.clip(x * scale_inv, FP8_MIN, FP8_MAX).astype(LP_DTYPE)
    assert jnp.allclose(out.astype(jnp.float32), ref.astype(jnp.float32)), \
        "per-tensor mismatch"

    # --- per-tensor case with a non-512-divisible element count (tail path) ---
    x_odd = jax.random.normal(k3, (3, 5, 7, 11), dtype=jnp.float32) * 2.0
    scale_inv_odd = jnp.float32(FP8_MAX) / jnp.max(jnp.abs(x_odd))
    out_odd = jax.block_until_ready(quant_input_forward(x_odd, scale_inv_odd))
    ref_odd = jnp.clip(x_odd * scale_inv_odd, FP8_MIN, FP8_MAX).astype(LP_DTYPE)
    assert out_odd.shape == x_odd.shape
    assert jnp.allclose(out_odd.astype(jnp.float32), ref_odd.astype(jnp.float32)), \
        "per-tensor (tail) mismatch"

    # --- per-channel case: weight-like 2D tensor with per-row scale_inv ---
    w = jax.random.normal(k2, (8, 128), dtype=jnp.float32) * 2.0
    scale_inv_pc = jnp.float32(FP8_MAX) / (jnp.max(jnp.abs(w), axis=1) + 1e-6)

    out_pc = jax.block_until_ready(quant_input_forward(w, scale_inv_pc))
    ref_pc = jnp.clip(w * scale_inv_pc[:, None], FP8_MIN, FP8_MAX).astype(LP_DTYPE)
    assert jnp.allclose(out_pc.astype(jnp.float32), ref_pc.astype(jnp.float32)), \
        "per-channel mismatch"

    print("KERNEL_OK")
</pallas_src>

<mosaic_0001>
module attributes {stable_mosaic.version = 11 : i64} {
  func.func @_quant_per_tensor_kernel(%arg0: i32, %arg1: memref<1xf32, #tpu.memory_space<smem>>, %arg2: memref<4x512xf32, #tpu.memory_space<vmem>>, %arg3: memref<4x512xf8E4M3FN, #tpu.memory_space<vmem>>) attributes {dimension_semantics = [#tpu.dimension_semantics<parallel>], iteration_bounds = array<i64: 1>, scalar_prefetch = 0 : i64, scratch_operands = 0 : i64, tpu.core_type = #tpu.core_type<tc>, window_params = [{transform_indices = @transform_0, window_bounds = array<i64: 1>}, {transform_indices = @transform_1, window_bounds = array<i64: 4, 512>}, {transform_indices = @transform_2, window_bounds = array<i64: 4, 512>}]} {
    %c0 = arith.constant 0 : index
    %0 = memref.load %arg1[%c0] : memref<1xf32, #tpu.memory_space<smem>>
    %c0_0 = arith.constant 0 : index
    %c0_1 = arith.constant 0 : index
    %1 = vector.load %arg2[%c0_0, %c0_1] : memref<4x512xf32, #tpu.memory_space<vmem>>, vector<4x512xf32>
    %2 = vector.broadcast %0 : f32 to vector<4x512xf32>
    %3 = arith.mulf %1, %2 : vector<4x512xf32>
    %cst = arith.constant -4.480000e+02 : f32
    %cst_2 = arith.constant 4.480000e+02 : f32
    %4 = vector.broadcast %cst : f32 to vector<4x512xf32>
    %5 = arith.maximumf %4, %3 : vector<4x512xf32>
    %6 = vector.broadcast %cst_2 : f32 to vector<4x512xf32>
    %7 = arith.minimumf %6, %5 : vector<4x512xf32>
    %8 = arith.truncf %7 : vector<4x512xf32> to vector<4x512xf8E4M3FN>
    %c0_3 = arith.constant 0 : index
    %c0_4 = arith.constant 0 : index
    %9 = vector.load %arg3[%c0_3, %c0_4] : memref<4x512xf8E4M3FN, #tpu.memory_space<vmem>>, vector<4x512xf8E4M3FN>
    tpu.vector_store %arg3[%c0_3, %c0_4], %8 {strides = array<i32>} : memref<4x512xf8E4M3FN, #tpu.memory_space<vmem>>, vector<4x512xf8E4M3FN>,
    return
  }
  func.func @transform_0(%arg0: i32) -> i32 {
    %c0_i32 = arith.constant 0 : i32
    %c0_i32_0 = arith.constant 0 : i32
    return %c0_i32 : i32
  }
  func.func @transform_1(%arg0: i32) -> (i32, i32) {
    %c0_i32 = arith.constant 0 : i32
    %c0_i32_0 = arith.constant 0 : i32
    return %arg0, %c0_i32 : i32, i32
  }
  func.func @transform_2(%arg0: i32) -> (i32, i32) {
    %c0_i32 = arith.constant 0 : i32
    %c0_i32_0 = arith.constant 0 : i32
    return %arg0, %c0_i32 : i32, i32
  }
}

</mosaic_0001>

<bundles_post_ra>
// kernel: tpu_custom_call.1
= control target key start
LH: loop header
LB: loop body
LE: loop exit
PB: predicated region body
PF: predicated region fallthrough
CT: control target
= control target key end

     0   :  { %8 = vsyncpa [#allocation4], 0  ;;  %s215_s0 = inlined_call_operand.<no memory space> [shape: f32[1], index: 0, kind: input, shape index: {}]   ;;  %s216_s1 = inlined_call_operand.hbm [shape: f32[4,512], index: 1, kind: input, shape index: {}]   ;;  %s217_s2 = inlined_call_operand.hbm [shape: f8e4m3fn[4,512], index: 2, kind: output, shape index: {}]  }
   0x1   :  { %9 = vsyncpa [#allocation5], 0  ;;  %s17_s11 = sshll.u32 %s216_s1, 4  ;;  %s189_s12 = smov [#allocation3]   ;;  %s18_s11 = int_to_ptr.hbm [resolvable:$true] %s17_s11 }
   0x2   :  { %s19_s13 = sshll.u32 %s189_s12, 4  ;;  %s20_s13 = int_to_ptr.vmem [resolvable:$true] %s19_s13 }
   0x3   :  { %22 = dma.hbm_to_vmem [thread:$0]  %s18_s11, 256, %s20_s13, [#allocation4]  }
   0x4   :  { %185 = dma.done.wait [#allocation4], 256  }
   0x5   :  { %186 = vsyncadd [#allocation4], 4294967040  ;;  %v30_v0 = vstv %s215_s0  ;;  %v28_v1 = vld [vmem:[#allocation3] sm:$0xff]  ;;  %v29_v2 = vld [vmem:[#allocation3 + $0x8] sm:$0xff]  ;;  %vm104_vm8 = vcmask 1040384   ;;  %vm108_vm9 = vcmask 1042434  }
   0x6   :  { %v31_v3 = vmul.f32 %v30_v0, %v28_v1  ;;  %v32_v4 = vmul.f32 %v30_v0, %v29_v2  ;;  %s190_s0 = smov [#allocation6]   ;;  %s123_s18 = sshll.u32 %s217_s2, 4  ;;  %vm112_vm10 = vcmask 1041408   ;;  %s124_s18 = int_to_ptr.hbm [resolvable:$true] %s123_s18 }
   0x7   :  { %s121_s1 = sshll.u32 %s190_s0, 4  ;;  %s122_s1 = int_to_ptr.vmem [resolvable:$true] %s121_s1 }
   0x8   :  { %v133_v5 = vclamps-f32 %v31_v3, 448.0  ;;  %v134_v6 = vclamps-f32 %v32_v4, 448.0 }
   0xa   :  { %39 = vst [vmem:[#allocation1] ss:$2 sm:$0xff] %v133_v5 }
   0xb   :  { %41 = vst [vmem:[#allocation1 + $0x10] ss:$2 sm:$0xff] %v134_v6 }
  0x11   :  { %v42_v7 = vld.sshfl [vmem:[#allocation1] sm:$0xff pattern:$0x75316420]  ;;  %v43_v8 = vld.sshfl [vmem:[#allocation1 + $0x8] sm:$0xff pattern:$0x75316420] }
  0x12   :  { %v44_v9 = vld.sshfl [vmem:[#allocation1 + $0x10] sm:$0xff pattern:$0x75316420]  ;;  %v50_v10 = vand.u32 2147483647, %v42_v7  ;;  %v51_v11 = vmul.f32 0.0625, %v42_v7  ;;  %vm53_vm0 = vweird.f32 %v42_v7  ;;  %vm65_vm1 = vweird.f32 %v43_v8 }
  0x13   :  { %v55_v12 = vshrl.u32 %v42_v7, 24  ;;  %v62_v13 = vand.u32 2147483647, %v43_v8  ;;  %v63_v14 = vmul.f32 0.0625, %v43_v8  ;;  %v67_v15 = vshrl.u32 %v43_v8, 24 }
  0x14   :  { %v75_v16 = vmul.f32 0.0625, %v44_v9  ;;  %v45_v17 = vld.sshfl [vmem:[#allocation1 + $0x18] sm:$0xff pattern:$0x75316420]  ;;  %v52_v18 = vcvt.f32.f8e4m3b11 %v51_v11  ;;  %v74_v19 = vand.u32 2147483647, %v44_v9  ;;  %vm77_vm3 = vweird.f32 %v44_v9 }
  0x15   :  { %v56_v20 = vand.u32 128, %v55_v12  ;;  %v64_v21 = vcvt.f32.f8e4m3b11 %v63_v14  ;;  %v68_v22 = vand.u32 128, %v67_v15  ;;  %vm57_vm2 = vcmp.le.f32.partialorder %v50_v10, 0.0009765625 }
  0x16   :  { %v76_v23 = vcvt.f32.f8e4m3b11 %v75_v16  ;;  %v54_v24 = vsel %vm53_vm0, 127, %v52_v18  ;;  %v79_v25 = vshrl.u32 %v44_v9, 24  ;;  %vm69_vm4 = vcmp.le.f32.partialorder %v62_v13, 0.0009765625 }
  0x17   :  { %v66_v26 = vsel %vm65_vm1, 127, %v64_v21  ;;  %v87_v28 = vmul.f32 0.0625, %v45_v17  ;;  %vm81_vm5 = vcmp.le.f32.partialorder %v74_v19, 0.0009765625  ;;  %v86_v31 = vand.u32 2147483647, %v45_v17 }
  0x18   :  { %v78_v27 = vsel %vm77_vm3, 127, %v76_v23  ;;  %v70_v29 = vsel %vm69_vm4, %v68_v22, %v66_v26  ;;  %v80_v30 = vand.u32 128, %v79_v25  ;;  %v58_v32 = vsel %vm57_vm2, %v56_v20, %v54_v24 }
  0x19   :  { %v71_v33 = vpack.c.b16 %v70_v29, %v70_v29  ;;  %v88_v34 = vcvt.f32.f8e4m3b11 %v87_v28  ;;  %v91_v35 = vshrl.u32 %v45_v17, 24  ;;  %vm89_vm6 = vweird.f32 %v45_v17 }
  0x1a   :  { %v82_v36 = vsel %vm81_vm5, %v80_v30, %v78_v27  ;;  %v59_v41 = vpack.c.b16 %v58_v32, %v58_v32  ;;  %vm93_vm7 = vcmp.le.f32.partialorder %v86_v31, 0.0009765625 }
  0x1b   :  { %v72_v37 = vpack.c.b8 %v71_v33, %v71_v33  ;;  %v83_v38 = vpack.c.b16 %v82_v36, %v82_v36  ;;  %v90_v39 = vsel %vm89_vm6, 127, %v88_v34  ;;  %v92_v40 = vand.u32 128, %v91_v35 }
  0x1c   :  { %v60_v46 = vpack.c.b8 %v59_v41, %v59_v41 }
  0x1d   :  { %v84_v42 = vpack.c.b8 %v83_v38, %v83_v38  ;;  %v94_v43 = vsel %vm93_vm7, %v92_v40, %v90_v39  ;;  %v101_v45 = vrot.slane %v72_v37, 7 }
  0x1e   :  { %v95_v44 = vpack.c.b16 %v94_v43, %v94_v43 }
  0x1f   :  { %v102_v48 = vrot.slane %v84_v42, 6  ;;  %v107_v50 = vsel %vm104_vm8, %v60_v46, %v101_v45 }
  0x20   :  { %v96_v47 = vpack.c.b8 %v95_v44, %v95_v44 }
  0x22   :  { %v103_v49 = vrot.slane %v96_v47, 5 }
  0x24   :  { %v111_v51 = vsel %vm108_vm9, %v102_v48, %v103_v49 }
  0x25   :  { %v113_v52 = vsel %vm112_vm10, %v107_v50, %v111_v51 }
  0x26   :  { %115 = vst [vmem:[#allocation6] sm:$0xf] %v113_v52 }
  0x27   :  { %126 = dma.vmem_to_hbm [thread:$0]  %s122_s1, 64, %s124_s18, [#allocation5]  }
  0x28   :  { %187 = dma.done.wait [#allocation5], 64  }
  0x29   :  { %188 = vsyncadd [#allocation5], 4294967232 }
  0x2a   :  { %131 = vsyncpa [#allocation4], 1 }
  0x2b   :  { %132 = vsyncpa [#allocation5], 1 }

</bundles_post_ra>
